<compile_context>
chip_gen: v5e
topology: v5e:2x2
jax: 0.10.0
libtpu: 0.0.40
codegen_flags: <defaults>
</compile_context>

<pallas_src>
import functools

import jax
import jax.numpy as jnp
from jax.experimental import pallas as pl
from jax.experimental.pallas import tpu as pltpu

_VMEM_LIMIT = 32 * 1024 * 1024  # explicit VMEM budget: safe on v5e/v6e/v7x


def _ceil_to(x, m):
    return (x + m - 1) // m * m


# ----------------------------- Pallas kernels -------------------------------

def _mm_kernel(*refs, act, has_bias, stats):
    """Tiled matmul, f32 accumulator, fused bias/act and fused BN statistics.

    Ref order: a, b, [bias], out, [col_sum, col_sumsq], acc_scratch.
    """
    a_ref, b_ref = refs[0], refs[1]
    idx = 2
    bias_ref = None
    if has_bias:
        bias_ref = refs[idx]
        idx += 1
    o_ref = refs[idx]
    idx += 1
    if stats:
        sum_ref, sq_ref = refs[idx], refs[idx + 1]
        idx += 2
    acc_ref = refs[idx]

    @pl.when(pl.program_id(2) == 0)
    def _():
        acc_ref[...] = jnp.zeros_like(acc_ref)

    acc_ref[...] += jnp.dot(a_ref[...], b_ref[...],
                            preferred_element_type=jnp.float32)

    @pl.when(pl.program_id(2) == pl.num_programs(2) - 1)
    def _():
        r = acc_ref[...]
        if has_bias:
            r = r + bias_ref[...]
        if act == "leaky":                        # LeakyReLU(0.1)
            r = jnp.where(r > 0, r, 0.1 * r)
        o_ref[...] = r.astype(o_ref.dtype)
        if stats:
            sum_ref[...] = jnp.sum(r, axis=0).reshape(sum_ref.shape)
            sq_ref[...] = jnp.sum(r * r, axis=0).reshape(sq_ref.shape)


@functools.partial(jax.jit, static_argnames=("act", "stats", "out_dtype"))
def pallas_matmul(a, b, bias=None, *, act="none", stats=False,
                  out_dtype=jnp.float32):
    """(M,K) @ (K,N) [+ bias[N]] with optional LeakyReLU(0.1) and fused
    per-column sum / sum-of-squares outputs (for BatchNorm statistics)."""
    M, K = a.shape
    K2, N = b.shape
    assert K == K2
    has_bias = bias is not None

    # bf16 MXU operands, f32 accumulation.
    a = a.astype(jnp.bfloat16)
    b = b.astype(jnp.bfloat16)

    # Tiling: tiny M stays a single (possibly sub-8) tile, K is a single
    # full-extent block (K <= 4608 in this model -> no k loop, no K padding),
    # N tiles are either full-extent (<=512) or 256-aligned (lane-dense,
    # fills v6e/v7x's 256-wide MXU).
    tm = M if M <= 128 else 128
    tn = N if N <= 512 else 256
    tk = K if K <= 8192 else 512
    Mp, Np, Kp = _ceil_to(M, tm), _ceil_to(N, tn), _ceil_to(K, tk)
    if Mp != M or Kp != K:
        a = jnp.pad(a, ((0, Mp - M), (0, Kp - K)))
    if Kp != K or Np != N:
        b = jnp.pad(b, ((0, Kp - K), (0, Np - N)))

    operands = [a, b]
    in_specs = [pl.BlockSpec((tm, tk), lambda i, j, k: (i, k)),
                pl.BlockSpec((tk, tn), lambda i, j, k: (k, j))]
    if has_bias:
        bias_p = bias.astype(jnp.float32)
        if Np != N:
            bias_p = jnp.pad(bias_p, (0, Np - N))
        operands.append(bias_p.reshape(1, Np))
        in_specs.append(pl.BlockSpec((1, tn), lambda i, j, k: (0, j)))

    mt = Mp // tm
    out_shapes = [jax.ShapeDtypeStruct((Mp, Np), out_dtype)]
    out_specs = [pl.BlockSpec((tm, tn), lambda i, j, k: (i, j))]
    if stats:
        out_shapes += [jax.ShapeDtypeStruct((mt, 1, Np), jnp.float32)] * 2
        out_specs += [pl.BlockSpec((1, 1, tn), lambda i, j, k: (i, 0, j))] * 2

    itemsize_out = jnp.dtype(out_dtype).itemsize
    cost = pl.CostEstimate(
        flops=2 * Mp * Kp * Np,
        transcendentals=0,
        bytes_accessed=(Mp * Kp + Kp * Np) * 2 + Mp * Np * itemsize_out)

    res = pl.pallas_call(
        functools.partial(_mm_kernel, act=act, has_bias=has_bias, stats=stats),
        out_shape=out_shapes,
        grid_spec=pltpu.PrefetchScalarGridSpec(
            num_scalar_prefetch=0,
            grid=(mt, Np // tn, Kp // tk),
            in_specs=in_specs,
            out_specs=out_specs,
            scratch_shapes=[pltpu.VMEM((tm, tn), jnp.float32)]),
        compiler_params=pltpu.CompilerParams(
            dimension_semantics=("parallel", "parallel", "arbitrary"),
            vmem_limit_bytes=_VMEM_LIMIT),
        cost_estimate=cost,
    )(*operands)
    if not isinstance(res, (list, tuple)):
        res = (res,)

    y = res[0][:M, :N]
    if stats:
        colsum = jnp.sum(res[1], axis=(0, 1))[:N]
        colsq = jnp.sum(res[2], axis=(0, 1))[:N]
        return y, colsum, colsq
    return y


def _bn_act_kernel(*refs, relu, has_res):
    """y = x*scale + shift [+ residual]; optional ReLU.  scale/shift are (1,C)
    blocks broadcast inside the kernel."""
    x_ref = refs[0]
    idx = 1
    res_ref = None
    if has_res:
        res_ref = refs[idx]
        idx += 1
    scale_ref, shift_ref, o_ref = refs[idx], refs[idx + 1], refs[idx + 2]

    y = x_ref[...].astype(jnp.float32) * scale_ref[...] + shift_ref[...]
    if has_res:
        y = y + res_ref[...].astype(jnp.float32)
    if relu:
        y = jnp.maximum(y, 0.0)
    o_ref[...] = y.astype(o_ref.dtype)


@functools.partial(jax.jit, static_argnames=("relu",))
def pallas_bn_act(x2d, scale, shift, residual=None, relu=True):
    R, C = x2d.shape
    has_res = residual is not None
    tr = R if R <= 1024 else 1024          # row-tiled, channel dim lane-dense
    grid = (pl.cdiv(R, tr),)

    operands = [x2d]
    in_specs = [pl.BlockSpec((tr, C), lambda i: (i, 0))]
    if has_res:
        operands.append(residual)
        in_specs.append(pl.BlockSpec((tr, C), lambda i: (i, 0)))
    operands += [scale.reshape(1, C).astype(jnp.float32),
                 shift.reshape(1, C).astype(jnp.float32)]
    in_specs += [pl.BlockSpec((1, C), lambda i: (0, 0)),
                 pl.BlockSpec((1, C), lambda i: (0, 0))]

    return pl.pallas_call(
        functools.partial(_bn_act_kernel, relu=relu, has_res=has_res),
        out_shape=jax.ShapeDtypeStruct((R, C), jnp.bfloat16),
        grid_spec=pltpu.PrefetchScalarGridSpec(
            num_scalar_prefetch=0,
            grid=grid,
            in_specs=in_specs,
            out_specs=pl.BlockSpec((tr, C), lambda i: (i, 0))),
        compiler_params=pltpu.CompilerParams(
            dimension_semantics=("parallel",),
            vmem_limit_bytes=_VMEM_LIMIT),
    )(*operands)


# ------------------------------- JAX glue ------------------------------------

def _im2col(x_nhwc, kh, kw, stride, pad):
    # TODO(synk): 3x3/7x7 patch extraction still materializes the im2col copy;
    # folding the taps into the matmul index_map is left for future work.
    if kh == 1 and kw == 1 and pad == 0:
        if stride != 1:
            x_nhwc = x_nhwc[:, ::stride, ::stride, :]
        N, H, W, C = x_nhwc.shape
        return x_nhwc.reshape(N * H * W, C), H, W
    if pad:
        x_nhwc = jnp.pad(x_nhwc, ((0, 0), (pad, pad), (pad, pad), (0, 0)))
    N, H, W, C = x_nhwc.shape
    oh = (H - kh) // stride + 1
    ow = (W - kw) // stride + 1
    cols = []
    for i in range(kh):
        for j in range(kw):
            cols.append(x_nhwc[:, i:i + stride * oh:stride,
                               j:j + stride * ow:stride, :])
    cols = jnp.concatenate(cols, axis=-1)           # (N, oh, ow, kh*kw*C)
    return cols.reshape(N * oh * ow, kh * kw * C), oh, ow


def _w_to_mat(w):
    # PyTorch conv weight (Cout, Cin, KH, KW) -> (KH*KW*Cin, Cout),
    # matching the im2col column ordering above.  Done once at init.
    cout, cin, kh, kw = w.shape
    return jnp.transpose(w, (2, 3, 1, 0)).reshape(kh * kw * cin, cout)


def _bn_scale_shift(colsum, colsq, m, gamma, beta, eps=1e-5):
    # PyTorch nn.BatchNorm2d default (train mode): batch stats, biased var.
    mean = colsum / m
    var = jnp.maximum(colsq / m - mean * mean, 0.0)
    scale = gamma * jax.lax.rsqrt(var + eps)
    shift = beta - mean * scale
    return scale, shift


def _conv_bn(x_nhwc, wmat, gamma, beta, kh, kw, stride, pad,
             residual2d=None, relu=True):
    N = x_nhwc.shape[0]
    cout = wmat.shape[1]
    cols, oh, ow = _im2col(x_nhwc, kh, kw, stride, pad)
    # Conv matmul with BN statistics fused into the epilogue (no extra passes
    # over the conv output for mean/var).
    y, colsum, colsq = pallas_matmul(cols, wmat, act="none", stats=True,
                                     out_dtype=jnp.bfloat16)
    scale, shift = _bn_scale_shift(colsum, colsq, cols.shape[0], gamma, beta)
    y = pallas_bn_act(y, scale, shift, residual=residual2d, relu=relu)
    return y.reshape(N, oh, ow, cout)


def _bottleneck(x, blk, stride):
    N, H, W, Cin = x.shape
    if "dw" in blk:   # downsample branch: 1x1 conv (stride s) + BN, no ReLU
        ident = _conv_bn(x, blk["dw"], blk["dg"], blk["db"], 1, 1,
                         stride=stride, pad=0, relu=False)
        ident2d = ident.reshape(-1, ident.shape[-1])
    else:
        ident2d = x.reshape(N * H * W, Cin)
    out = _conv_bn(x, blk["w1"], blk["g1"], blk["b1"], 1, 1, stride=1, pad=0)
    out = _conv_bn(out, blk["w2"], blk["g2"], blk["b2"], 3, 3,
                   stride=stride, pad=1)
    # conv3 + bn3 + residual add + ReLU (fused into the elementwise kernel)
    out = _conv_bn(out, blk["w3"], blk["g3"], blk["b3"], 1, 1, stride=1, pad=0,
                   residual2d=ident2d, relu=True)
    return out


def _maxpool_3x3_s2_p1(x_nhwc):
    return jax.lax.reduce_window(
        x_nhwc, jnp.array(-jnp.inf, x_nhwc.dtype), jax.lax.max,
        window_dimensions=(1, 3, 3, 1), window_strides=(1, 2, 2, 1),
        padding=((0, 0), (1, 1), (1, 1), (0, 0)))


# --------------------------- parameters (synthetic) --------------------------

def init_params(key):
    keys = iter(jax.random.split(key, 256))

    def conv_mat(cout, cin, k):
        fan_in = cin * k * k
        w = (jax.random.normal(next(keys), (cout, cin, k, k), jnp.float32)
             / jnp.sqrt(fan_in))
        # Pre-transform once to a matmul-ready bf16 (K, Cout) matrix.
        return _w_to_mat(w).astype(jnp.bfloat16)

    def bn_p(c):
        g = 1.0 + 0.1 * jax.random.normal(next(keys), (c,), jnp.float32)
        b = 0.1 * jax.random.normal(next(keys), (c,), jnp.float32)
        return g, b

    def lin(cout, cin, pad_out_to=None):
        w = (jax.random.normal(next(keys), (cout, cin), jnp.float32)
             / jnp.sqrt(cin))
        b = 0.1 * jax.random.normal(next(keys), (cout,), jnp.float32)
        wm = w.T.astype(jnp.bfloat16)          # (cin, cout), matmul-ready bf16
        if pad_out_to is not None and pad_out_to > cout:
            wm = jnp.pad(wm, ((0, 0), (0, pad_out_to - cout)))
            b = jnp.pad(b, (0, pad_out_to - cout))
        return wm, b

    params = {}
    params["conv1_w"] = conv_mat(64, 3, 7)
    params["bn1_g"], params["bn1_b"] = bn_p(64)

    layers = []
    inplanes = 64
    # ResNet-50: (planes, num_blocks) per stage; strides handled in forward.
    for planes, nblocks, _stride in [(64, 3, 1), (128, 4, 2),
                                     (256, 6, 2), (512, 3, 2)]:
        blocks = []
        for bidx in range(nblocks):
            blk = {}
            blk["w1"] = conv_mat(planes, inplanes, 1)
            blk["g1"], blk["b1"] = bn_p(planes)
            blk["w2"] = conv_mat(planes, planes, 3)
            blk["g2"], blk["b2"] = bn_p(planes)
            blk["w3"] = conv_mat(planes * 4, planes, 1)
            blk["g3"], blk["b3"] = bn_p(planes * 4)
            if bidx == 0:
                blk["dw"] = conv_mat(planes * 4, inplanes, 1)
                blk["dg"], blk["db"] = bn_p(planes * 4)
            blocks.append(blk)
            inplanes = planes * 4
        layers.append(blocks)
    params["layers"] = layers

    # backbone.fc replaced: Linear(2048, 1024); head: fc2 Linear(1024, S*S*E).
    # fc2 output pre-padded to 768 (= 3*256) for lane-dense N tiles.
    params["fc_w"], params["fc_b"] = lin(1024, 2048)
    params["fc2_w"], params["fc2_b"] = lin(7 * 7 * 12, 1024, pad_out_to=768)
    return params


# ------------------------------- forward -------------------------------------

_STAGE_STRIDES = (1, 2, 2, 2)


@functools.partial(jax.jit, static_argnames=("S", "B", "C"))
def yolo_forward(params, x_nchw, S=7, B=2, C=2):
    E = C + 5 * B
    bs = x_nchw.shape[0]
    # F.interpolate(x, scale_factor=0.5) -- default 'nearest': out[i] = in[2i]
    x = x_nchw[:, :, ::2, ::2]
    # NCHW -> NHWC, bf16 activations throughout the backbone.
    x = jnp.transpose(x, (0, 2, 3, 1)).astype(jnp.bfloat16)

    # ResNet-50 backbone
    x = _conv_bn(x, params["conv1_w"], params["bn1_g"], params["bn1_b"],
                 7, 7, stride=2, pad=3)
    x = _maxpool_3x3_s2_p1(x)
    for li, blocks in enumerate(params["layers"]):
        for bi, blk in enumerate(blocks):
            s = _STAGE_STRIDES[li] if bi == 0 else 1
            x = _bottleneck(x, blk, s)
    feat = jnp.mean(x.astype(jnp.float32), axis=(1, 2))   # AdaptiveAvgPool2d

    # backbone.fc (2048->1024) with fused act1 = LeakyReLU(0.1);
    # Dropout(p=0.0) is the identity.
    h = pallas_matmul(feat, params["fc_w"], params["fc_b"],
                      act="leaky", out_dtype=jnp.bfloat16)
    # fc2: 1024 -> S*S*E (weight pre-padded to 768 output cols; slice back)
    out = pallas_matmul(h, params["fc2_w"], params["fc2_b"],
                        act="none", out_dtype=jnp.float32)
    out = out[:, :S * S * E]
    return out.reshape(bs, S, S, E)


# --------------------------------- main ---------------------------------------

if __name__ == "__main__":
    key = jax.random.PRNGKey(0)
    kp, kx = jax.random.split(key)
    params = init_params(kp)
    # Small input consistent with the module (NCHW, 3 channels). 64x64 spatial
    # survives the 0.5x interpolate + ResNet-50's 5 stride-2 stages.
    x = jax.random.normal(kx, (2, 3, 64, 64), jnp.float32)

    out = yolo_forward(params, x)
    out = jax.block_until_ready(out)
    assert out.shape == (2, 7, 7, 12), out.shape
    assert out.dtype == jnp.float32
    print("KERNEL_OK")
</pallas_src>

<mosaic_0001>
module attributes {stable_mosaic.version = 11 : i64} {
  func.func @_mm_kernel(%arg0: i32, %arg1: i32, %arg2: i32, %arg3: memref<128x147xbf16, #tpu.memory_space<vmem>>, %arg4: memref<147x64xbf16, #tpu.memory_space<vmem>>, %arg5: memref<128x64xbf16, #tpu.memory_space<vmem>>, %arg6: memref<1x1x64xf32, #tpu.memory_space<vmem>>, %arg7: memref<1x1x64xf32, #tpu.memory_space<vmem>>, %arg8: memref<128x64xf32, #tpu.memory_space<vmem>>) attributes {dimension_semantics = [#tpu.dimension_semantics<parallel>, #tpu.dimension_semantics<parallel>, #tpu.dimension_semantics<arbitrary>], iteration_bounds = array<i64: 4, 1, 1>, scalar_prefetch = 0 : i64, scratch_operands = 1 : i64, tpu.core_type = #tpu.core_type<tc>, window_params = [{transform_indices = @transform_0, window_bounds = array<i64: 128, 147>}, {transform_indices = @transform_1, window_bounds = array<i64: 147, 64>}, {transform_indices = @transform_2, window_bounds = array<i64: 128, 64>}, {transform_indices = @transform_3, window_bounds = array<i64: 1, 1, 64>}, {transform_indices = @transform_4, window_bounds = array<i64: 1, 1, 64>}]} {
    %c0_i32 = arith.constant 0 : i32
    %0 = arith.cmpi eq, %arg2, %c0_i32 : i32
    %1 = arith.extui %0 : i1 to i32
    %c0_i32_0 = arith.constant 0 : i32
    %2 = arith.cmpi ne, %1, %c0_i32_0 : i32
    scf.if %2 {
      %cst_10 = arith.constant 0.000000e+00 : f32
      %12 = vector.broadcast %cst_10 : f32 to vector<128x64xf32>
      %c0_11 = arith.constant 0 : index
      %c0_12 = arith.constant 0 : index
      %13 = vector.load %arg8[%c0_11, %c0_12] : memref<128x64xf32, #tpu.memory_space<vmem>>, vector<128x64xf32>
      tpu.vector_store %arg8[%c0_11, %c0_12], %12 {strides = array<i32>} : memref<128x64xf32, #tpu.memory_space<vmem>>, vector<128x64xf32>,
    } else {
    }
    %c0 = arith.constant 0 : index
    %c0_1 = arith.constant 0 : index
    %3 = vector.load %arg8[%c0, %c0_1] : memref<128x64xf32, #tpu.memory_space<vmem>>, vector<128x64xf32>
    %c0_2 = arith.constant 0 : index
    %c0_3 = arith.constant 0 : index
    %4 = vector.load %arg3[%c0_2, %c0_3] : memref<128x147xbf16, #tpu.memory_space<vmem>>, vector<128x147xbf16>
    %c0_4 = arith.constant 0 : index
    %c0_5 = arith.constant 0 : index
    %5 = vector.load %arg4[%c0_4, %c0_5] : memref<147x64xbf16, #tpu.memory_space<vmem>>, vector<147x64xbf16>
    %cst = arith.constant dense<0.000000e+00> : vector<128x64xf32>
    %6 = tpu.matmul %4, %5, %cst {dimension_numbers = #tpu.dot_dimension_numbers<[1], [0], [0], [1], [0, 0, 1, 1], [], []>} : vector<128x147xbf16>, vector<147x64xbf16>, vector<128x64xf32> -> vector<128x64xf32>
    %7 = arith.addf %3, %6 : vector<128x64xf32>
    %c0_6 = arith.constant 0 : index
    %c0_7 = arith.constant 0 : index
    %8 = vector.load %arg8[%c0_6, %c0_7] : memref<128x64xf32, #tpu.memory_space<vmem>>, vector<128x64xf32>
    tpu.vector_store %arg8[%c0_6, %c0_7], %7 {strides = array<i32>} : memref<128x64xf32, #tpu.memory_space<vmem>>, vector<128x64xf32>,
    %c0_i32_8 = arith.constant 0 : i32
    %9 = arith.cmpi eq, %arg2, %c0_i32_8 : i32
    %10 = arith.extui %9 : i1 to i32
    %c0_i32_9 = arith.constant 0 : i32
    %11 = arith.cmpi ne, %10, %c0_i32_9 : i32
    scf.if %11 {
      %c0_10 = arith.constant 0 : index
      %c0_11 = arith.constant 0 : index
      %12 = vector.load %arg8[%c0_10, %c0_11] : memref<128x64xf32, #tpu.memory_space<vmem>>, vector<128x64xf32>
      %13 = arith.truncf %12 : vector<128x64xf32> to vector<128x64xbf16>
      %c0_12 = arith.constant 0 : index
      %c0_13 = arith.constant 0 : index
      %14 = vector.load %arg5[%c0_12, %c0_13] : memref<128x64xbf16, #tpu.memory_space<vmem>>, vector<128x64xbf16>
      tpu.vector_store %arg5[%c0_12, %c0_13], %13 {strides = array<i32>} : memref<128x64xbf16, #tpu.memory_space<vmem>>, vector<128x64xbf16>,
      %cst_14 = arith.constant dense<0.000000e+00> : vector<64xf32>
      %15 = vector.multi_reduction <add>, %12, %cst_14 [0] : vector<128x64xf32> to vector<64xf32>
      %16 = vector.shape_cast %15 : vector<64xf32> to vector<1x1x64xf32>
      %c0_15 = arith.constant 0 : index
      %c0_16 = arith.constant 0 : index
      %c0_17 = arith.constant 0 : index
      %17 = vector.load %arg6[%c0_15, %c0_16, %c0_17] : memref<1x1x64xf32, #tpu.memory_space<vmem>>, vector<1x1x64xf32>
      tpu.vector_store %arg6[%c0_15, %c0_16, %c0_17], %16 {strides = array<i32>} : memref<1x1x64xf32, #tpu.memory_space<vmem>>, vector<1x1x64xf32>,
      %18 = arith.mulf %12, %12 : vector<128x64xf32>
      %cst_18 = arith.constant dense<0.000000e+00> : vector<64xf32>
      %19 = vector.multi_reduction <add>, %18, %cst_18 [0] : vector<128x64xf32> to vector<64xf32>
      %20 = vector.shape_cast %19 : vector<64xf32> to vector<1x1x64xf32>
      %c0_19 = arith.constant 0 : index
      %c0_20 = arith.constant 0 : index
      %c0_21 = arith.constant 0 : index
      %21 = vector.load %arg7[%c0_19, %c0_20, %c0_21] : memref<1x1x64xf32, #tpu.memory_space<vmem>>, vector<1x1x64xf32>
      tpu.vector_store %arg7[%c0_19, %c0_20, %c0_21], %20 {strides = array<i32>} : memref<1x1x64xf32, #tpu.memory_space<vmem>>, vector<1x1x64xf32>,
    } else {
    }
    return
  }
  func.func @transform_0(%arg0: i32, %arg1: i32, %arg2: i32) -> (i32, i32) {
    %c0_i32 = arith.constant 0 : i32
    return %arg0, %arg2 : i32, i32
  }
  func.func @transform_1(%arg0: i32, %arg1: i32, %arg2: i32) -> (i32, i32) {
    %c0_i32 = arith.constant 0 : i32
    return %arg2, %arg1 : i32, i32
  }
  func.func @transform_2(%arg0: i32, %arg1: i32, %arg2: i32) -> (i32, i32) {
    %c0_i32 = arith.constant 0 : i32
    return %arg0, %arg1 : i32, i32
  }
  func.func @transform_3(%arg0: i32, %arg1: i32, %arg2: i32) -> (i32, i32, i32) {
    %c0_i32 = arith.constant 0 : i32
    %c0_i32_0 = arith.constant 0 : i32
    return %arg0, %c0_i32, %arg1 : i32, i32, i32
  }
  func.func @transform_4(%arg0: i32, %arg1: i32, %arg2: i32) -> (i32, i32, i32) {
    %c0_i32 = arith.constant 0 : i32
    %c0_i32_0 = arith.constant 0 : i32
    return %arg0, %c0_i32, %arg1 : i32, i32, i32
  }
}

</mosaic_0001>

<bundles_post_ra>
// kernel: pallas_matmul.1
= control target key start
LH: loop header
LB: loop body
LE: loop exit
PB: predicated region body
PF: predicated region fallthrough
CT: control target
= control target key end

     0   :  { %s1229_s15 = smov 0   ;;  %s1231_s16 = smov 0   ;;  %s1516_s0 = inlined_call_operand.vmem [shape: bf16[512,147], index: 0, kind: input, shape index: {}]   ;;  %s1517_s1 = inlined_call_operand.vmem [shape: bf16[147,64], index: 1, kind: input, shape index: {}]   ;;  %s1518_s2 = inlined_call_operand.vmem [shape: bf16[512,64], index: 2, kind: output, shape index: {0}]   ;;  %s1519_s3 = inlined_call_operand.vmem [shape: f32[4,1,64], index: 3, kind: output, shape index: {1}]   ;;  %s1520_s4 = inlined_call_operand.vmem [shape: f32[4,1,64], index: 4, kind: output, shape index: {2}]  }
   0x1   :  { %s1233_s17 = smov 0  }
   0x2 LB: > { %s34_s18 = sadd.s32 1, %s1196_s16  ;;  %p1000_p0 = scmp.ge.s32.totalorder %s1200_s17, 1  ;;  %s1200_s17 = sphi %s1233_s17, %s15_s17   ;;  %s1196_s16 = sphi %s1231_s16, %s1522_s16   ;;  %s1192_s15 = sphi %s1229_s15, %s1521_s15  }
   0x3   : > { %p36_p1 = scmp.ge.s32.totalorder %s34_s18, 4  ;;  %p217_p2 = scmp.lt.s32.totalorder %s1200_s17, 5 }
   0x5   : > { %s1524_s18 = smov (%p36_p1, %s34_s18), 0  ;;  %p218_p3 = pnand %p1000_p0, %p217_p2 }
   0x6   : > { %s1001_s23 = sshll.u32 (!%p218_p3), %s1192_s15, 4  ;;  %p301_p5 = scmp.lt.s32.totalorder (!%p218_p3), %s1192_s15, 3 }
   0x7   : > { %221 = sbr.rel (%p218_p3) target bundleno = 273 (0x111), region = 28  ;;  %p273_p4 = scmp.lt.s32.totalorder (!%p218_p3), %s1001_s23, 63 }
   0xc   : > { %v1140_v0 = vld [vmem:[%s1517_s1 + $0x38] sm:$0xff]  ;;  %v385_v1 = vld [vmem:[%s1517_s1 + $0x48] sm:$0x3]  ;;  %vm540_vm0 = vcmask 1040384   ;;  %vm541_vm1 = vcmask 1041408   ;;  %v1139_v3 = vld [vmem:[%s1517_s1 + $0x30] sm:$0xff] }
   0xd   : > { %v495_v2 = vunpack.c.l.b16 %v385_v1  ;;  %547 = vmatpush.bf16.msra.mxu0 %v1140_v0  ;;  %1142 = vmatpush.bf16.msra.mxu2 %v1140_v0  ;;  %v1202_v4 = vmov 65535   ;;  %s1526_s23 = smov (!%p273_p4, %s1001_s23), 63  ;;  %v1138_v9 = vld [vmem:[%s1517_s1 + $0x28] sm:$0xff]  ;;  %v1141_v10 = vld [vmem:[%s1517_s1 + $0x40] sm:$0xff]  ;;  %vm515_vm2 = vcmask 154624   ;;  %v1136_v15 = vld [vmem:[%s1517_s1 + $0x18] sm:$0xff] }
   0xe   : > { %v542_v5 = vsel %vm540_vm0, 4294967295, %v1202_v4  ;;  %s1116_s28 = sshll.u32 %s1526_s23, 3  ;;  %v1137_v14 = vld [vmem:[%s1517_s1 + $0x20] sm:$0xff]  ;;  %v1135_v18 = vld [vmem:[%s1517_s1 + $0x10] sm:$0xff]  ;;  %v1134_v20 = vld [vmem:[%s1517_s1 + $0x8] sm:$0xff]  ;;  %vm318_vm3 = vcmask 523264  }
   0xf   : > { %v505_v6 = vpack.c.b16 %v495_v2, %v495_v2  ;;  %v543_v7 = vsel %vm541_vm1, %v542_v5, 0  ;;  %s1271_s7 = scalar_lea.vmem %s1516_s0, %s1116_s28  ;;  %v1133_v24 = vld [vmem:[%s1517_s1] sm:$0xff]  ;;  %v1203_v0 = vmov 0.0   ;;  %s1005_s22 = sshll.u32 %s1526_s23, 2  ;;  %vm713_vm4 = vcmask 519168  }
  0x10   : > { %v1117_v11 = vld [vmem:[%s1271_s7 + $0x4] sm:$0xf]  ;;  %v1010_v12 = vld [vmem:[%s1271_s7 + $0x8] sm:$0xf0]  ;;  %v1127_v16 = vld [vmem:[%s1271_s7 + $0x54] sm:$0xf]  ;;  %s1351_s26 = scalar_lea.vmem %s1518_s2, %s1005_s22 }
  0x11   : > { %v545_v8 = vand.u32 %v543_v7, %v505_v6  ;;  %548 = vmatpush.bf16.msra.mxu0 %v1139_v3  ;;  %1143 = vmatpush.bf16.msra.mxu2 %v1139_v3  ;;  %v1013_v13 = vor.u32 %v1117_v11, %v1010_v12  ;;  %v1050_v17 = vld [vmem:[%s1271_s7 + $0x58] sm:$0xf0]  ;;  %v1119_v21 = vld [vmem:[%s1271_s7 + $0x14] sm:$0xf]  ;;  %v1008_v25 = vld [vmem:[%s1271_s7] sm:$0xf] }
  0x12   : > { %v1053_v19 = vor.u32 %v1127_v16, %v1050_v17  ;;  %v1018_v22 = vld [vmem:[%s1271_s7 + $0x18] sm:$0xf0]  ;;  %v1118_v26 = vld [vmem:[%s1271_s7 + $0x4] sm:$0xf0]  ;;  %v1040_v27 = vld [vmem:[%s1271_s7 + $0x40] sm:$0xf] }
  0x13   : > { %602 = vmatpush.bf16.msra.mxu1 %v545_v8  ;;  %1150 = vmatpush.bf16.msra.mxu3 %v545_v8  ;;  %v1021_v23 = vor.u32 %v1119_v21, %v1018_v22  ;;  %v1126_v28 = vld [vmem:[%s1271_s7 + $0x44] sm:$0xf0]  ;;  %v1009_v29 = vor.u32 %v1118_v26, %v1008_v25  ;;  %v1129_v31 = vld [vmem:[%s1271_s7 + $0x64] sm:$0xf]  ;;  %v1058_v32 = vld [vmem:[%s1271_s7 + $0x68] sm:$0xf0] }
  0x14   : > { %v1041_v30 = vor.u32 %v1126_v28, %v1040_v27  ;;  %v1061_v33 = vor.u32 %v1129_v31, %v1058_v32  ;;  %v1121_v34 = vld [vmem:[%s1271_s7 + $0x24] sm:$0xf]  ;;  %v1026_v35 = vld [vmem:[%s1271_s7 + $0x28] sm:$0xf0]  ;;  %v1016_v37 = vld [vmem:[%s1271_s7 + $0x10] sm:$0xf] }
  0x15   : > { %549 = vmatpush.bf16.msra.mxu0 %v1138_v9  ;;  %1144 = vmatpush.bf16.msra.mxu2 %v1138_v9  ;;  %v1029_v36 = vor.u32 %v1121_v34, %v1026_v35  ;;  %v1120_v38 = vld [vmem:[%s1271_s7 + $0x14] sm:$0xf0]  ;;  %v1048_v39 = vld [vmem:[%s1271_s7 + $0x50] sm:$0xf]  ;;  %v1131_v43 = vld [vmem:[%s1271_s7 + $0x74] sm:$0xf] }
  0x16   : > { %v1128_v40 = vld [vmem:[%s1271_s7 + $0x54] sm:$0xf0]  ;;  %v1017_v41 = vor.u32 %v1120_v38, %v1016_v37  ;;  %v1066_v44 = vld [vmem:[%s1271_s7 + $0x78] sm:$0xf0]  ;;  %v1123_v46 = vld [vmem:[%s1271_s7 + $0x34] sm:$0xf] }
  0x17   : > { %603 = vmatpush.bf16.msra.mxu1 %v1141_v10  ;;  %1151 = vmatpush.bf16.msra.mxu3 %v1141_v10  ;;  %v1049_v42 = vor.u32 %v1128_v40, %v1048_v39  ;;  %v1069_v45 = vor.u32 %v1131_v43, %v1066_v44  ;;  %v1034_v47 = vld [vmem:[%s1271_s7 + $0x38] sm:$0xf0]  ;;  %v1024_v49 = vld [vmem:[%s1271_s7 + $0x20] sm:$0xf]  ;;  %v1122_v50 = vld [vmem:[%s1271_s7 + $0x24] sm:$0xf0] }
  0x18   : > { %v1037_v48 = vor.u32 %v1123_v46, %v1034_v47  ;;  %v1056_v51 = vld [vmem:[%s1271_s7 + $0x60] sm:$0xf]  ;;  %v1130_v52 = vld [vmem:[%s1271_s7 + $0x64] sm:$0xf0]  ;;  %v1025_v53 = vor.u32 %v1122_v50, %v1024_v49  ;;  %v1125_v55 = vld [vmem:[%s1271_s7 + $0x44] sm:$0xf] }
  0x19   : > { %550 = vmatpush.bf16.msra.mxu0 %v1137_v14  ;;  %1145 = vmatpush.bf16.msra.mxu2 %v1137_v14  ;;  %v1057_v54 = vor.u32 %v1130_v52, %v1056_v51  ;;  %v1042_v56 = vld [vmem:[%s1271_s7 + $0x48] sm:$0xf0]  ;;  %v1032_v58 = vld [vmem:[%s1271_s7 + $0x30] sm:$0xf]  ;;  %v1124_v59 = vld [vmem:[%s1271_s7 + $0x34] sm:$0xf0] }
  0x1a   : > { %1106 = vmatmul.msk.bf16.vlgmr.msra.gmra.mxu1 %vm515_vm2, %v1013_v13  ;;  %1111 = vmatmul.msk.bf16.vlgmr.msra.gmra.mxu3 %vm515_vm2, %v1053_v19  ;;  %v1045_v57 = vor.u32 %v1125_v55, %v1042_v56  ;;  %v1064_v60 = vld [vmem:[%s1271_s7 + $0x70] sm:$0xf]  ;;  %v1132_v61 = vld [vmem:[%s1271_s7 + $0x74] sm:$0xf0]  ;;  %v1033_v62 = vor.u32 %v1124_v59, %v1032_v58  ;;  %319 = vst.msk [vmem:[#allocation2] sm:$0xff] %vm318_vm3, %v1203_v0  ;;  %s1528_s15 = smov (!%p301_p5, %s1192_s15), 3 }
  0x1b   : > { %v1065_v63 = vor.u32 %v1132_v61, %v1064_v60  ;;  %320 = vst.msk [vmem:[#allocation2 + $0x8] sm:$0xff] %vm318_vm3, %v1203_v0  ;;  %s306_s28 = scalar_lea.vmem %s1519_s3, %s1528_s15  ;;  %vm767_vm5 = vcmask 516096   ;;  %s312_s5 = scalar_lea.vmem %s1520_s4, %s1528_s15 }
  0x1c   : > { %321 = vst.msk [vmem:[#allocation2 + $0x10] sm:$0xff] %vm318_vm3, %v1203_v0 }
  0x1d   : > { %551 = vmatpush.bf16.msra.mxu0 %v1136_v15  ;;  %1146 = vmatpush.bf16.msra.mxu2 %v1136_v15  ;;  %322 = vst.msk [vmem:[#allocation2 + $0x18] sm:$0xff] %vm318_vm3, %v1203_v0 }
  0x1e   : > { %323 = vst.msk [vmem:[#allocation2 + $0x20] sm:$0xff] %vm318_vm3, %v1203_v0 }
  0x1f   : > { %324 = vst.msk [vmem:[#allocation2 + $0x28] sm:$0xff] %vm318_vm3, %v1203_v0 }
  0x20   : > { %325 = vst.msk [vmem:[#allocation2 + $0x30] sm:$0xff] %vm318_vm3, %v1203_v0 }
  0x21   : > { %552 = vmatpush.bf16.msra.mxu0 %v1135_v18  ;;  %1147 = vmatpush.bf16.msra.mxu2 %v1135_v18  ;;  %326 = vst.msk [vmem:[#allocation2 + $0x38] sm:$0xff] %vm318_vm3, %v1203_v0  ;;  %v335_v4 = vld [vmem:[#allocation2] sm:$0xff] }
  0x22   : > { %327 = vst.msk [vmem:[#allocation2 + $0x40] sm:$0xff] %vm318_vm3, %v1203_v0  ;;  %v336_v10 = vld [vmem:[#allocation2 + $0x8] sm:$0xff] }
  0x23   : > { %328 = vst.msk [vmem:[#allocation2 + $0x48] sm:$0xff] %vm318_vm3, %v1203_v0  ;;  %v337_v19 = vld [vmem:[#allocation2 + $0x10] sm:$0xff] }
  0x24   : > { %329 = vst.msk [vmem:[#allocation2 + $0x50] sm:$0xff] %vm318_vm3, %v1203_v0 }
  0x25   : > { %553 = vmatpush.bf16.msra.mxu0 %v1134_v20  ;;  %1148 = vmatpush.bf16.msra.mxu2 %v1134_v20  ;;  %330 = vst.msk [vmem:[#allocation2 + $0x58] sm:$0xff] %vm318_vm3, %v1203_v0 }
  0x26   : > { %331 = vst.msk [vmem:[#allocation2 + $0x60] sm:$0xff] %vm318_vm3, %v1203_v0 }
  0x27   : > { %332 = vst.msk [vmem:[#allocation2 + $0x68] sm:$0xff] %vm318_vm3, %v1203_v0 }
  0x28   : > { %333 = vst.msk [vmem:[#allocation2 + $0x70] sm:$0xff] %vm318_vm3, %v1203_v0 }
  0x29   : > { %554 = vmatpush.bf16.msra.mxu0 %v1133_v24  ;;  %1149 = vmatpush.bf16.msra.mxu2 %v1133_v24  ;;  %334 = vst.msk [vmem:[#allocation2 + $0x78] sm:$0xff] %vm318_vm3, %v1203_v0 }
  0x2a   : > { %1107 = vmatmul.msk.bf16.gmra.mxu1 %vm515_vm2, %v1021_v23  ;;  %1112 = vmatmul.msk.bf16.gmra.mxu3 %vm515_vm2, %v1061_v33 }
  0x2b   : > { %v345_v28 = vld [vmem:[#allocation2 + $0x50] sm:$0xff] }
  0x2c   : > { %555 = vmatmul.bf16.vlgmr.msra.gmra.mxu0 %v1009_v29  ;;  %575 = vmatmul.bf16.vlgmr.msra.gmra.mxu2 %v1041_v30  ;;  %v338_v29 = vld [vmem:[#allocation2 + $0x18] sm:$0xff] }
  0x2d   : > { %v346_v39 = vld [vmem:[#allocation2 + $0x58] sm:$0xff] }
  0x3a   : > { %1108 = vmatmul.msk.bf16.gmra.mxu1 %vm515_vm2, %v1029_v36  ;;  %1113 = vmatmul.msk.bf16.gmra.mxu3 %vm515_vm2, %v1069_v45 }
  0x3c   : > { %560 = vmatmul.bf16.gmra.mxu0 %v1017_v41  ;;  %580 = vmatmul.bf16.gmra.mxu2 %v1049_v42  ;;  %v339_v41 = vld [vmem:[#allocation2 + $0x20] sm:$0xff] }
  0x4a   : > { %1109 = vmatmul.msk.bf16.gmra.mxu1 %vm515_vm2, %v1037_v48 }
  0x4c   : > { %565 = vmatmul.bf16.gmra.mxu0 %v1025_v53  ;;  %585 = vmatmul.bf16.gmra.mxu2 %v1057_v54  ;;  %v347_v53 = vld [vmem:[#allocation2 + $0x60] sm:$0xff]  ;;  %v340_v54 = vld [vmem:[#allocation2 + $0x28] sm:$0xff] }
  0x5a   : > { %1110 = vmatmul.msk.bf16.gmra.mxu1 %vm515_vm2, %v1045_v57 }
  0x5c   : > { %570 = vmatmul.bf16.gmra.mxu0 %v1033_v62  ;;  %590 = vmatmul.bf16.gmra.mxu2 %v1065_v63 }
  0x97   : > { %v605_v1 = vpop.f32.mrf.mxu1 }
  0x9d   : > { %v630_v14 = vpop.f32.mrf.mxu3 }
  0x9f   : > { %v607_v2 = vpop.f32.mrf.mxu1 }
  0xa5   : > { %v632_v26 = vpop.f32.mrf.mxu3 }
  0xa7   : > { %v610_v3 = vpop.f32.mrf.mxu1 }
  0xa9   : > { %v556_v5 = vpop.f32.mrf.mxu0 }
  0xaa   : > { %v606_v6 = vadd.f32 %v605_v1, %v556_v5  ;;  %v343_v1 = vld [vmem:[#allocation2 + $0x40] sm:$0xff]  ;;  %v348_v5 = vld [vmem:[#allocation2 + $0x68] sm:$0xff] }
  0xac   : > { %v645_v7 = vadd.f32 %v606_v6, %v335_v4 }
  0xad   : > { %v635_v40 = vpop.f32.mrf.mxu3 }
  0xae   : > { %662 = vst.msk [vmem:[#allocation2] sm:$0xff] %vm318_vm3, %v645_v7  ;;  %v341_v7 = vld [vmem:[#allocation2 + $0x30] sm:$0xff] }
  0xaf   : > { %v612_v8 = vpop.f32.mrf.mxu1  ;;  %v1345_v9 = vpop.f32.mrf.mxu2 }
  0xb1   : > { %v558_v11 = vpop.f32.mrf.mxu0 }
  0xb2   : > { %v608_v12 = vadd.f32 %v607_v2, %v558_v11 }
  0xb4   : > { %v646_v13 = vadd.f32 %v608_v12, %v336_v10 }
  0xb5   : > { %v1353_v15 = vld [vmem:[#allocation2] sm:$0xff]  ;;  %v637_v58 = vpop.f32.mrf.mxu3 }
  0xb6   : > { %v697_v16 = vpack.c.bf16 %v1353_v15, %v1353_v15  ;;  %663 = vst.msk [vmem:[#allocation2 + $0x8] sm:$0xff] %vm318_vm3, %v646_v13 }
  0xb7   : > { %v615_v17 = vpop.f32.mrf.mxu1  ;;  %v1360_v18 = vpop.f32.mrf.mxu2 }
  0xb8   : > { %714 = vst.msk [vmem:[%s1351_s26] sm:$0xf] %vm713_vm4, %v697_v16 }
  0xb9   : > { %v561_v20 = vpop.f32.mrf.mxu0 }
  0xba   : > { %v611_v21 = vadd.f32 %v610_v3, %v561_v20 }
  0xbc   : > { %v647_v22 = vadd.f32 %v611_v21, %v337_v19  ;;  %v344_v21 = vld [vmem:[#allocation2 + $0x48] sm:$0xff] }
  0xbd   : > { %v1362_v23 = vld [vmem:[#allocation2 + $0x8] sm:$0xff]  ;;  %v640_v16 = vpop.f32.mrf.mxu3 }
  0xbe   : > { %v698_v24 = vpack.c.bf16 %v1362_v23, %v1362_v23  ;;  %664 = vst.msk [vmem:[#allocation2 + $0x10] sm:$0xff] %vm318_vm3, %v647_v22  ;;  %v770_v19 = vmul.f32 %v1362_v23, %v1362_v23 }
  0xbf   : > { %v617_v25 = vpop.f32.mrf.mxu1  ;;  %v581_v27 = vpop.f32.mrf.mxu2 }
  0xc0   : > { %715 = vst.msk [vmem:[%s1351_s26 + $0x4] sm:$0xf] %vm713_vm4, %v698_v24  ;;  %v631_v31 = vadd.f32 %v630_v14, %v581_v27  ;;  %v769_v24 = vmul.f32 %v1353_v15, %v1353_v15 }
  0xc1   : > { %v563_v30 = vpop.f32.mrf.mxu0 }
  0xc2   : > { %v613_v32 = vadd.f32 %v612_v8, %v563_v30  ;;  %v655_v33 = vadd.f32 %v631_v31, %v345_v28  ;;  %v342_v31 = vld [vmem:[#allocation2 + $0x38] sm:$0xff] }
  0xc4   : > { %v648_v34 = vadd.f32 %v613_v32, %v338_v29  ;;  %672 = vst.msk [vmem:[#allocation2 + $0x50] sm:$0xff] %vm318_vm3, %v655_v33  ;;  %v730_v29 = vsel %vm318_vm3, %v1353_v15, 0.0 }
  0xc5   : > { %v1369_v35 = vld [vmem:[#allocation2 + $0x10] sm:$0xff] }
  0xc6   : > { %v699_v36 = vpack.c.bf16 %v1369_v35, %v1369_v35  ;;  %665 = vst.msk [vmem:[#allocation2 + $0x18] sm:$0xff] %vm318_vm3, %v648_v34  ;;  %v771_v27 = vmul.f32 %v1369_v35, %v1369_v35  ;;  %v786_v34 = vsel %vm318_vm3, %v770_v19, 0.0 }
  0xc7   : > { %v620_v37 = vpop.f32.mrf.mxu1  ;;  %v583_v38 = vpop.f32.mrf.mxu2 }
  0xc8   : > { %716 = vst.msk [vmem:[%s1351_s26 + $0x8] sm:$0xf] %vm713_vm4, %v699_v36  ;;  %v633_v43 = vadd.f32 %v632_v26, %v583_v38  ;;  %v731_v26 = vsel %vm318_vm3, %v1362_v23, 0.0  ;;  %v349_v38 = vld [vmem:[#allocation2 + $0x70] sm:$0xff] }
  0xc9   : > { %v566_v42 = vpop.f32.mrf.mxu0 }
  0xca   : > { %v616_v44 = vadd.f32 %v615_v17, %v566_v42  ;;  %v656_v45 = vadd.f32 %v633_v43, %v346_v39  ;;  %v785_v39 = vsel %vm318_vm3, %v769_v24, 0.0 }
  0xcb   : > { %v1377_v46 = vld [vmem:[#allocation2 + $0x50] sm:$0xff] }
  0xcc   : > { %v649_v47 = vadd.f32 %v616_v44, %v339_v41  ;;  %v707_v49 = vpack.c.bf16 %v1377_v46, %v1377_v46  ;;  %673 = vst.msk [vmem:[#allocation2 + $0x58] sm:$0xff] %vm318_vm3, %v656_v45  ;;  %v788_v41 = vsel %vm318_vm3, %v771_v27, 0.0  ;;  %v787_v45 = vadd.f32 %v786_v34, %v785_v39 }
  0xcd   : > { %v1379_v48 = vld [vmem:[#allocation2 + $0x18] sm:$0xff] }
  0xce   : > { %v700_v50 = vpack.c.bf16 %v1379_v48, %v1379_v48  ;;  %666 = vst.msk [vmem:[#allocation2 + $0x20] sm:$0xff] %vm318_vm3, %v649_v47  ;;  %v772_v23 = vmul.f32 %v1379_v48, %v1379_v48  ;;  %v735_v42 = vsel %vm318_vm3, %v1379_v48, 0.0 }
  0xcf   : > { %v622_v51 = vpop.f32.mrf.mxu1  ;;  %724 = vst.msk [vmem:[%s1351_s26 + $0x28] sm:$0xf] %vm713_vm4, %v707_v49  ;;  %v586_v52 = vpop.f32.mrf.mxu2 }
  0xd0   : > { %717 = vst.msk [vmem:[%s1351_s26 + $0xc] sm:$0xf] %vm713_vm4, %v700_v50  ;;  %v636_v56 = vadd.f32 %v635_v40, %v586_v52  ;;  %v732_v40 = vadd.f32 %v731_v26, %v730_v29  ;;  %v790_v52 = vsel %vm318_vm3, %v772_v23, 0.0  ;;  %v749_v23 = vsel %vm318_vm3, %v1377_v46, 0.0 }
  0xd1   : > { %v568_v55 = vpop.f32.mrf.mxu0 }
  0xd2   : > { %v618_v57 = vadd.f32 %v617_v25, %v568_v55  ;;  %v657_v59 = vadd.f32 %v636_v56, %v347_v53  ;;  %v642_v55 = vpop.f32.mrf.mxu3  ;;  %v789_v56 = vadd.f32 %v788_v41, %v787_v45 }
  0xd3   : > { %v1391_v60 = vld [vmem:[#allocation2 + $0x58] sm:$0xff] }
  0xd4   : > { %v650_v61 = vadd.f32 %v618_v57, %v340_v54  ;;  %v708_v63 = vpack.c.bf16 %v1391_v60, %v1391_v60  ;;  %674 = vst.msk [vmem:[#allocation2 + $0x60] sm:$0xff] %vm318_vm3, %v657_v59  ;;  %v751_v41 = vsel %vm318_vm3, %v1391_v60, 0.0 }
  0xd5   : > { %v1393_v62 = vld [vmem:[#allocation2 + $0x20] sm:$0xff] }
  0xd6   : > { %v701_v0 = vpack.c.bf16 %v1393_v62, %v1393_v62  ;;  %667 = vst.msk [vmem:[#allocation2 + $0x28] sm:$0xff] %vm318_vm3, %v650_v61  ;;  %v737_v48 = vsel %vm318_vm3, %v1393_v62, 0.0 }
  0xd7   : > { %v625_v2 = vpop.f32.mrf.mxu1  ;;  %725 = vst.msk [vmem:[%s1351_s26 + $0x2c] sm:$0xf] %vm713_vm4, %v708_v63  ;;  %v588_v4 = vpop.f32.mrf.mxu2 }
  0xd8   : > { %v626_v3 = vadd.f32 %v625_v2, %v1345_v9  ;;  %718 = vst.msk [vmem:[%s1351_s26 + $0x10] sm:$0xf] %vm713_vm4, %v701_v0  ;;  %v638_v10 = vadd.f32 %v637_v58, %v588_v4  ;;  %v350_v0 = vld [vmem:[#allocation2 + $0x78] sm:$0xff] }
  0xd9   : > { %v571_v8 = vpop.f32.mrf.mxu0 }
  0xda   : > { %v653_v6 = vadd.f32 %v626_v3, %v343_v1  ;;  %v621_v11 = vadd.f32 %v620_v37, %v571_v8  ;;  %v658_v12 = vadd.f32 %v638_v10, %v348_v5 }
  0xdb   : > { %v1407_v13 = vld [vmem:[#allocation2 + $0x60] sm:$0xff] }
  0xdc   : > { %670 = vst.msk [vmem:[#allocation2 + $0x40] sm:$0xff] %vm318_vm3, %v653_v6  ;;  %v651_v14 = vadd.f32 %v621_v11, %v341_v7  ;;  %v709_v9 = vpack.c.bf16 %v1407_v13, %v1407_v13 }
  0xdd   : > { %v686_v17 = vld [vmem:[#allocation2 + $0x28] sm:$0xff]  ;;  %675 = vst.msk [vmem:[#allocation2 + $0x68] sm:$0xff] %vm318_vm3, %v658_v12 }
  0xde   : > { %v702_v20 = vpack.c.bf16 %v686_v17, %v686_v17  ;;  %668 = vst.msk [vmem:[#allocation2 + $0x30] sm:$0xff] %vm318_vm3, %v651_v14  ;;  %v774_v53 = vmul.f32 %v686_v17, %v686_v17  ;;  %v739_v59 = vsel %vm318_vm3, %v686_v17, 0.0 }
  0xdf   : > { %v627_v22 = vpop.f32.mrf.mxu1  ;;  %726 = vst.msk [vmem:[%s1351_s26 + $0x30] sm:$0xf] %vm713_vm4, %v709_v9  ;;  %v591_v28 = vpop.f32.mrf.mxu2 }
  0xe0   : > { %v628_v25 = vadd.f32 %v627_v22, %v1360_v18  ;;  %719 = vst.msk [vmem:[%s1351_s26 + $0x14] sm:$0xf] %vm713_vm4, %v702_v20  ;;  %v641_v33 = vadd.f32 %v640_v16, %v591_v28  ;;  %v733_v18 = vsel %vm318_vm3, %v1369_v35, 0.0  ;;  %v773_v35 = vmul.f32 %v1393_v62, %v1393_v62 }
  0xe1   : > { %v573_v32 = vpop.f32.mrf.mxu0  ;;  %v734_v47 = vadd.f32 %v733_v18, %v732_v40  ;;  %v791_v62 = vadd.f32 %v790_v52, %v789_v56  ;;  %v794_v3 = vsel %vm318_vm3, %v774_v53, 0.0 }
  0xe2   : > { %v654_v30 = vadd.f32 %v628_v25, %v344_v21  ;;  %v623_v37 = vadd.f32 %v622_v51, %v573_v32  ;;  %v659_v51 = vadd.f32 %v641_v33, %v349_v38  ;;  %v792_v58 = vsel %vm318_vm3, %v773_v35, 0.0 }
  0xe3   : > { %v689_v36 = vld [vmem:[#allocation2 + $0x40] sm:$0xff]  ;;  %v736_v57 = vadd.f32 %v735_v42, %v734_v47  ;;  %v793_v6 = vadd.f32 %v792_v58, %v791_v62  ;;  %v781_v42 = vmul.f32 %v1407_v13, %v1407_v13  ;;  %v753_v47 = vsel %vm318_vm3, %v1407_v13, 0.0 }
  0xe4   : > { %v705_v15 = vpack.c.bf16 %v689_v36, %v689_v36  ;;  %671 = vst.msk [vmem:[#allocation2 + $0x48] sm:$0xff] %vm318_vm3, %v654_v30  ;;  %v1440_v43 = vld [vmem:[#allocation2 + $0x68] sm:$0xff]  ;;  %v652_v44 = vadd.f32 %v623_v37, %v342_v31  ;;  %v777_v17 = vmul.f32 %v689_v36, %v689_v36  ;;  %v745_v24 = vsel %vm318_vm3, %v689_v36, 0.0 }
  0xe5   : > { %v687_v49 = vld [vmem:[#allocation2 + $0x30] sm:$0xff]  ;;  %v710_v50 = vpack.c.bf16 %v1440_v43, %v1440_v43  ;;  %v738_v1 = vadd.f32 %v737_v48, %v736_v57  ;;  %676 = vst.msk [vmem:[#allocation2 + $0x70] sm:$0xff] %vm318_vm3, %v659_v51  ;;  %v795_v12 = vadd.f32 %v794_v3, %v793_v6  ;;  %v779_v31 = vmul.f32 %v1377_v46, %v1377_v46 }
  0xe6   : > { %722 = vst.msk [vmem:[%s1351_s26 + $0x20] sm:$0xf] %vm713_vm4, %v705_v15  ;;  %v703_v54 = vpack.c.bf16 %v687_v49, %v687_v49  ;;  %v775_v61 = vmul.f32 %v687_v49, %v687_v49  ;;  %v741_v4 = vsel %vm318_vm3, %v687_v49, 0.0  ;;  %v800_v32 = vsel %vm318_vm3, %v777_v17, 0.0 }
  0xe7   : > { %669 = vst.msk [vmem:[#allocation2 + $0x38] sm:$0xff] %vm318_vm3, %v652_v44  ;;  %v593_v63 = vpop.f32.mrf.mxu2  ;;  %v740_v7 = vadd.f32 %v739_v59, %v738_v1  ;;  %v780_v36 = vmul.f32 %v1391_v60, %v1391_v60  ;;  %v804_v15 = vsel %vm318_vm3, %v779_v31, 0.0  ;;  %v782_v49 = vmul.f32 %v1440_v43, %v1440_v43 }
  0xe8   : > { %727 = vst.msk [vmem:[%s1351_s26 + $0x34] sm:$0xf] %vm713_vm4, %v710_v50  ;;  %v643_v2 = vadd.f32 %v642_v55, %v593_v63  ;;  %v796_v11 = vsel %vm318_vm3, %v775_v61, 0.0  ;;  %v808_v60 = vsel %vm318_vm3, %v781_v42, 0.0  ;;  %v755_v52 = vsel %vm318_vm3, %v1440_v43, 0.0 }
  0xe9   : > { %720 = vst.msk [vmem:[%s1351_s26 + $0x18] sm:$0xf] %vm713_vm4, %v703_v54  ;;  %v742_v14 = vadd.f32 %v741_v4, %v740_v7  ;;  %v797_v21 = vadd.f32 %v796_v11, %v795_v12  ;;  %v806_v46 = vsel %vm318_vm3, %v780_v36, 0.0  ;;  %v810_v55 = vsel %vm318_vm3, %v782_v49, 0.0 }
  0xea   : > { %v660_v10 = vadd.f32 %v643_v2, %v350_v0 }
  0xeb   : > { %v690_v5 = vld [vmem:[#allocation2 + $0x48] sm:$0xff] }
  0xec   : > { %v706_v8 = vpack.c.bf16 %v690_v5, %v690_v5  ;;  %677 = vst.msk [vmem:[#allocation2 + $0x78] sm:$0xff] %vm318_vm3, %v660_v10  ;;  %v778_v25 = vmul.f32 %v690_v5, %v690_v5  ;;  %v695_v27 = vld [vmem:[#allocation2 + $0x70] sm:$0xff]  ;;  %v747_v33 = vsel %vm318_vm3, %v690_v5, 0.0 }
  0xed   : > { %v711_v30 = vpack.c.bf16 %v695_v27, %v695_v27  ;;  %v783_v48 = vmul.f32 %v695_v27, %v695_v27  ;;  %v757_v13 = vsel %vm318_vm3, %v695_v27, 0.0 }
  0xee   : > { %723 = vst.msk [vmem:[%s1351_s26 + $0x24] sm:$0xf] %vm713_vm4, %v706_v8  ;;  %v688_v16 = vld [vmem:[#allocation2 + $0x38] sm:$0xff]  ;;  %v802_v37 = vsel %vm318_vm3, %v778_v25, 0.0 }
  0xef   : > { %v704_v9 = vpack.c.bf16 %v688_v16, %v688_v16  ;;  %v743_v19 = vsel %vm318_vm3, %v688_v16, 0.0  ;;  %v776_v20 = vmul.f32 %v688_v16, %v688_v16  ;;  %728 = vst.msk [vmem:[%s1351_s26 + $0x38] sm:$0xf] %vm713_vm4, %v711_v30  ;;  %v812_v59 = vsel %vm318_vm3, %v783_v48, 0.0 }
  0xf0   : > { %v744_v22 = vadd.f32 %v743_v19, %v742_v14 }
  0xf1   : > { %721 = vst.msk [vmem:[%s1351_s26 + $0x1c] sm:$0xf] %vm713_vm4, %v704_v9  ;;  %v798_v26 = vsel %vm318_vm3, %v776_v20, 0.0 }
  0xf2   : > { %v746_v28 = vadd.f32 %v745_v24, %v744_v22  ;;  %v799_v29 = vadd.f32 %v798_v26, %v797_v21 }
  0xf3   : > { %v696_v40 = vld [vmem:[#allocation2 + $0x78] sm:$0xff] }
  0xf4   : > { %v748_v34 = vadd.f32 %v747_v33, %v746_v28  ;;  %v801_v18 = vadd.f32 %v800_v32, %v799_v29  ;;  %v712_v35 = vpack.c.bf16 %v696_v40, %v696_v40  ;;  %v784_v56 = vmul.f32 %v696_v40, %v696_v40 }
  0xf5   : > { %v759_v61 = vsel %vm318_vm3, %v696_v40, 0.0 }
  0xf6   : > { %v750_v38 = vadd.f32 %v749_v23, %v748_v34  ;;  %v803_v39 = vadd.f32 %v802_v37, %v801_v18  ;;  %729 = vst.msk [vmem:[%s1351_s26 + $0x3c] sm:$0xf] %vm713_vm4, %v712_v35  ;;  %v814_v43 = vsel %vm318_vm3, %v784_v56, 0.0 }
  0xf8   : > { %v805_v44 = vadd.f32 %v804_v15, %v803_v39  ;;  %v752_v45 = vadd.f32 %v751_v41, %v750_v38 }
  0xfa   : > { %v754_v50 = vadd.f32 %v753_v47, %v752_v45  ;;  %v807_v51 = vadd.f32 %v806_v46, %v805_v44 }
  0xfc   : > { %v756_v53 = vadd.f32 %v755_v52, %v754_v50  ;;  %v809_v54 = vadd.f32 %v808_v60, %v807_v51 }
  0xfe   : > { %v758_v57 = vadd.f32 %v757_v13, %v756_v53  ;;  %v811_v58 = vadd.f32 %v810_v55, %v809_v54 }
 0x100   : > { %v813_v63 = vadd.f32 %v812_v59, %v811_v58  ;;  %v760_v0 = vadd.f32 %v759_v61, %v758_v57 }
 0x102   : > { %v761_v62 = vrot.slane %v760_v0, 4  ;;  %v815_v1 = vadd.f32 %v814_v43, %v813_v63 }
 0x104   : > { %v762_v2 = vadd.f32 %v761_v62, %v760_v0  ;;  %v816_v3 = vrot.slane %v815_v1, 4 }
 0x106   : > { %v763_v4 = vrot.slane %v762_v2, 2  ;;  %v817_v5 = vadd.f32 %v816_v3, %v815_v1 }
 0x108   : > { %v764_v6 = vadd.f32 %v763_v4, %v762_v2  ;;  %v818_v7 = vrot.slane %v817_v5, 2 }
 0x10a   : > { %v765_v8 = vrot.slane %v764_v6, 1  ;;  %v819_v10 = vadd.f32 %v818_v7, %v817_v5 }
 0x10c   : > { %v766_v11 = vadd.f32 %v765_v8, %v764_v6  ;;  %v820_v12 = vrot.slane %v819_v10, 1 }
 0x10e   : > { %768 = vst.msk [vmem:[%s306_s28] sm:$0x1] %vm767_vm5, %v766_v11  ;;  %v821_v14 = vadd.f32 %v820_v12, %v819_v10 }
 0x110   : > { %822 = vst.msk [vmem:[%s312_s5] sm:$0x1] %vm767_vm5, %v821_v14 }
 0x111 PF: > { %s15_s17 = sadd.s32 1, %s1200_s17   ;;  %s1521_s15 = smov %s1196_s16 }
 0x112   : > { %p12_p6 = scmp.ge.s32.totalorder %s15_s17, 6   ;;  %s1522_s16 = smov %s1524_s18 }
 0x114   :  { %14 = sbr.rel (!%p12_p6) target bundleno = 2 (0x2), region = 93 }

</bundles_post_ra>
